<compile_context>
chip_gen: v6e
topology: v6e:2x2x1
jax: 0.10.0
libtpu: 0.0.40
codegen_flags: <defaults>
</compile_context>

<pallas_src>
import functools

import jax
import jax.numpy as jnp
from jax.experimental import pallas as pl
from jax.experimental.pallas import tpu as pltpu

LANE = 128
SUBLANE = 8
HIDDEN = 512  # fixed inner width of the module


def _round_up(n, m):
    return ((n + m - 1) // m) * m


# ----------------------------------------------------------------------------
# Kernel: one batch tile, all four matmuls + biases + ReLUs, weights resident.
# ----------------------------------------------------------------------------
def _autoencoder_kernel(x_ref,
                        w1_ref, b1_ref,
                        w2_ref, b2_ref,
                        w3_ref, b3_ref,
                        w4_ref, b4_ref,
                        out_ref):
    cdt = w1_ref.dtype  # compute (matmul-operand) dtype: bf16

    x = x_ref[...].astype(cdt)

    # Encoder: Linear -> ReLU -> Linear
    h1 = jnp.dot(x, w1_ref[...], preferred_element_type=jnp.float32) + b1_ref[...]
    h1 = jnp.maximum(h1, 0.0).astype(cdt)
    z = jnp.dot(h1, w2_ref[...], preferred_element_type=jnp.float32) + b2_ref[...]

    # Decoder: Linear -> ReLU -> Linear
    h2 = jnp.dot(z.astype(cdt), w3_ref[...],
                 preferred_element_type=jnp.float32) + b3_ref[...]
    h2 = jnp.maximum(h2, 0.0).astype(cdt)
    y = jnp.dot(h2, w4_ref[...], preferred_element_type=jnp.float32) + b4_ref[...]

    out_ref[...] = y.astype(out_ref.dtype)


# ----------------------------------------------------------------------------
# One-time parameter preparation (outside the jitted per-call path).
# ----------------------------------------------------------------------------
def prepare_params(params, compute_dtype=jnp.bfloat16):
    """Transpose PyTorch-layout weights to [in, out], pad feature dims to 128
    lanes (zero padding -> results unchanged), cast weights to bf16, keep
    biases f32 as [1, out]."""
    input_dim = params["w1"].shape[1]
    hidden_dim = params["w2"].shape[0]
    d_in = _round_up(input_dim, LANE)
    d_h = _round_up(hidden_dim, LANE)

    def pad2(w, rows, cols):
        return jnp.pad(w, ((0, rows - w.shape[0]), (0, cols - w.shape[1])))

    def pad1(b, n):
        return jnp.pad(b, (0, n - b.shape[0])).reshape(1, n)

    w1 = pad2(params["w1"].T, d_in, HIDDEN)   # [d_in, 512]
    w2 = pad2(params["w2"].T, HIDDEN, d_h)    # [512, d_h]
    w3 = pad2(params["w3"].T, d_h, HIDDEN)    # [d_h, 512]
    w4 = pad2(params["w4"].T, HIDDEN, d_in)   # [512, d_in]

    return {
        "w1": w1.astype(compute_dtype),
        "w2": w2.astype(compute_dtype),
        "w3": w3.astype(compute_dtype),
        "w4": w4.astype(compute_dtype),
        "b1": pad1(params["b1"], HIDDEN).astype(jnp.float32),
        "b2": pad1(params["b2"], d_h).astype(jnp.float32),
        "b3": pad1(params["b3"], HIDDEN).astype(jnp.float32),
        "b4": pad1(params["b4"], d_in).astype(jnp.float32),
    }


# ----------------------------------------------------------------------------
# Forward wrapper.
# ----------------------------------------------------------------------------
@functools.partial(jax.jit, static_argnames=("tile_b",))
def autoencoder_forward(x, prepped, tile_b=256):
    """x: [B, input_dim] float32.  prepped: output of prepare_params()."""
    B, input_dim = x.shape
    d_in = prepped["w1"].shape[0]   # padded input/output feature dim
    d_h = prepped["w2"].shape[1]    # padded bottleneck dim

    # Pad feature dim to the lane-padded width used by the prepared weights.
    if d_in != input_dim:
        x = jnp.pad(x, ((0, 0), (0, d_in - input_dim)))

    # Batch tile: multiple of 8 sublanes, at most the requested tile; pad the
    # batch up to a tile multiple so every MXU pass is full.
    tb = _round_up(min(tile_b, _round_up(B, SUBLANE)), SUBLANE)
    Bp = _round_up(B, tb)
    if Bp != B:
        x = jnp.pad(x, ((0, Bp - B), (0, 0)))

    grid = (Bp // tb,)

    def x_map(i):
        return (i, 0)

    def full_map(i):
        return (0, 0)

    w1, b1 = prepped["w1"], prepped["b1"]
    w2, b2 = prepped["w2"], prepped["b2"]
    w3, b3 = prepped["w3"], prepped["b3"]
    w4, b4 = prepped["w4"], prepped["b4"]

    extra_kwargs = {}
    if hasattr(pl, "CostEstimate"):
        flops = 4 * Bp * HIDDEN * (d_in + d_h)  # 2 flops/MAC, 4 matmuls
        weight_bytes = sum(int(a.size * a.dtype.itemsize)
                           for a in (w1, b1, w2, b2, w3, b3, w4, b4))
        io_bytes = 2 * int(Bp * d_in * x.dtype.itemsize)
        extra_kwargs["cost_estimate"] = pl.CostEstimate(
            flops=flops, transcendentals=0,
            bytes_accessed=io_bytes + weight_bytes)

    out = pl.pallas_call(
        _autoencoder_kernel,
        out_shape=jax.ShapeDtypeStruct((Bp, d_in), x.dtype),
        grid_spec=pltpu.PrefetchScalarGridSpec(
            num_scalar_prefetch=0,
            grid=grid,
            in_specs=[
                pl.BlockSpec((tb, d_in), x_map),   # x tile
                pl.BlockSpec(w1.shape, full_map),  # w1 (resident; constant index)
                pl.BlockSpec(b1.shape, full_map),  # b1
                pl.BlockSpec(w2.shape, full_map),  # w2
                pl.BlockSpec(b2.shape, full_map),  # b2
                pl.BlockSpec(w3.shape, full_map),  # w3
                pl.BlockSpec(b3.shape, full_map),  # b3
                pl.BlockSpec(w4.shape, full_map),  # w4
                pl.BlockSpec(b4.shape, full_map),  # b4
            ],
            out_specs=pl.BlockSpec((tb, d_in), x_map),
        ),
        compiler_params=pltpu.CompilerParams(
            dimension_semantics=("parallel",),
        ),
        **extra_kwargs,
    )(x, w1, b1, w2, b2, w3, b3, w4, b4)

    return out[:B, :input_dim]


# ----------------------------------------------------------------------------
# Parameter init (PyTorch nn.Linear default layout/init) and references.
# ----------------------------------------------------------------------------
def init_params(key, input_dim, hidden_dim):
    """Weights stored in PyTorch layout [out_features, in_features]."""
    dims = [(HIDDEN, input_dim), (hidden_dim, HIDDEN),
            (HIDDEN, hidden_dim), (input_dim, HIDDEN)]
    params = {}
    keys = jax.random.split(key, 2 * len(dims))
    for idx, (out_f, in_f) in enumerate(dims):
        bound = 1.0 / jnp.sqrt(in_f)
        params[f"w{idx + 1}"] = jax.random.uniform(
            keys[2 * idx], (out_f, in_f), jnp.float32, -bound, bound)
        params[f"b{idx + 1}"] = jax.random.uniform(
            keys[2 * idx + 1], (out_f,), jnp.float32, -bound, bound)
    return params


def reference_forward(x, params):
    """Pure-JAX f32 reference matching the PyTorch forward."""
    h = jnp.maximum(x @ params["w1"].T + params["b1"], 0.0)
    z = h @ params["w2"].T + params["b2"]
    h2 = jnp.maximum(z @ params["w3"].T + params["b3"], 0.0)
    return h2 @ params["w4"].T + params["b4"]


def reference_forward_bf16(x, params):
    """Reference with the same bf16-operand / f32-accumulate numerics as the kernel."""
    bf = jnp.bfloat16

    def dot(a, w):
        return jnp.dot(a.astype(bf), w.T.astype(bf),
                       preferred_element_type=jnp.float32)

    h = jnp.maximum(dot(x, params["w1"]) + params["b1"], 0.0)
    z = dot(h, params["w2"]) + params["b2"]
    h2 = jnp.maximum(dot(z, params["w3"]) + params["b3"], 0.0)
    return dot(h2, params["w4"]) + params["b4"]


if __name__ == "__main__":
    input_dim = 256
    hidden_dim = 32

    key = jax.random.PRNGKey(0)
    k_x, k_p = jax.random.split(key)
    params = init_params(k_p, input_dim, hidden_dim)
    prepped = prepare_params(params)  # one-time prep, outside the call path

    # Case 1: tiny batch (single grid step; rows handled as one sublane tile).
    x_small = jax.random.normal(k_x, (8, input_dim), jnp.float32)
    out_small = jax.block_until_ready(autoencoder_forward(x_small, prepped))

    # Case 2: batch not a multiple of the tile -> multi-step grid + row padding.
    x_big = jax.random.normal(jax.random.PRNGKey(1), (72, input_dim), jnp.float32)
    out_big = jax.block_until_ready(
        autoencoder_forward(x_big, prepped, tile_b=32))

    for x, out in ((x_small, out_small), (x_big, out_big)):
        assert out.shape == x.shape
        ref_bf16 = reference_forward_bf16(x, params)
        ref_f32 = reference_forward(x, params)
        err_bf16 = float(jnp.max(jnp.abs(out - ref_bf16)))
        err_f32 = float(jnp.max(jnp.abs(out - ref_f32)))
        assert jnp.allclose(out, ref_bf16, atol=1e-3, rtol=1e-3), \
            f"mismatch vs bf16 reference (max err {err_bf16})"
        assert jnp.allclose(out, ref_f32, atol=1e-1, rtol=1e-1), \
            f"too far from f32 reference (max err {err_f32})"

    print("KERNEL_OK")
</pallas_src>

<mosaic_0001>
module attributes {stable_mosaic.version = 11 : i64} {
  func.func @_autoencoder_kernel(%arg0: i32, %arg1: memref<8x256xf32, #tpu.memory_space<vmem>>, %arg2: memref<256x512xbf16, #tpu.memory_space<vmem>>, %arg3: memref<1x512xf32, #tpu.memory_space<vmem>>, %arg4: memref<512x128xbf16, #tpu.memory_space<vmem>>, %arg5: memref<1x128xf32, #tpu.memory_space<vmem>>, %arg6: memref<128x512xbf16, #tpu.memory_space<vmem>>, %arg7: memref<1x512xf32, #tpu.memory_space<vmem>>, %arg8: memref<512x256xbf16, #tpu.memory_space<vmem>>, %arg9: memref<1x256xf32, #tpu.memory_space<vmem>>, %arg10: memref<8x256xf32, #tpu.memory_space<vmem>>) attributes {dimension_semantics = [#tpu.dimension_semantics<parallel>], iteration_bounds = array<i64: 1>, scalar_prefetch = 0 : i64, scratch_operands = 0 : i64, tpu.core_type = #tpu.core_type<tc>, window_params = [{transform_indices = @transform_0, window_bounds = array<i64: 8, 256>}, {pipeline_mode = #tpu.pipeline_mode<synchronous>, transform_indices = @transform_1, window_bounds = array<i64: 256, 512>}, {pipeline_mode = #tpu.pipeline_mode<synchronous>, transform_indices = @transform_2, window_bounds = array<i64: 1, 512>}, {pipeline_mode = #tpu.pipeline_mode<synchronous>, transform_indices = @transform_3, window_bounds = array<i64: 512, 128>}, {pipeline_mode = #tpu.pipeline_mode<synchronous>, transform_indices = @transform_4, window_bounds = array<i64: 1, 128>}, {pipeline_mode = #tpu.pipeline_mode<synchronous>, transform_indices = @transform_5, window_bounds = array<i64: 128, 512>}, {pipeline_mode = #tpu.pipeline_mode<synchronous>, transform_indices = @transform_6, window_bounds = array<i64: 1, 512>}, {pipeline_mode = #tpu.pipeline_mode<synchronous>, transform_indices = @transform_7, window_bounds = array<i64: 512, 256>}, {pipeline_mode = #tpu.pipeline_mode<synchronous>, transform_indices = @transform_8, window_bounds = array<i64: 1, 256>}, {transform_indices = @transform_9, window_bounds = array<i64: 8, 256>}]} {
    %c0 = arith.constant 0 : index
    %c0_0 = arith.constant 0 : index
    %0 = vector.load %arg1[%c0, %c0_0] : memref<8x256xf32, #tpu.memory_space<vmem>>, vector<8x256xf32>
    %1 = arith.truncf %0 : vector<8x256xf32> to vector<8x256xbf16>
    %c0_1 = arith.constant 0 : index
    %c0_2 = arith.constant 0 : index
    %2 = vector.load %arg2[%c0_1, %c0_2] : memref<256x512xbf16, #tpu.memory_space<vmem>>, vector<256x512xbf16>
    %cst = arith.constant dense<0.000000e+00> : vector<8x512xf32>
    %3 = tpu.matmul %1, %2, %cst {dimension_numbers = #tpu.dot_dimension_numbers<[1], [0], [0], [1], [0, 0, 1, 1], [], []>} : vector<8x256xbf16>, vector<256x512xbf16>, vector<8x512xf32> -> vector<8x512xf32>
    %c0_3 = arith.constant 0 : index
    %c0_4 = arith.constant 0 : index
    %4 = vector.load %arg3[%c0_3, %c0_4] : memref<1x512xf32, #tpu.memory_space<vmem>>, vector<1x512xf32>
    %5 = vector.broadcast %4 : vector<1x512xf32> to vector<8x512xf32>
    %6 = arith.addf %3, %5 : vector<8x512xf32>
    %cst_5 = arith.constant 0.000000e+00 : f32
    %7 = vector.broadcast %cst_5 : f32 to vector<8x512xf32>
    %8 = arith.maximumf %6, %7 : vector<8x512xf32>
    %9 = arith.truncf %8 : vector<8x512xf32> to vector<8x512xbf16>
    %c0_6 = arith.constant 0 : index
    %c0_7 = arith.constant 0 : index
    %10 = vector.load %arg4[%c0_6, %c0_7] : memref<512x128xbf16, #tpu.memory_space<vmem>>, vector<512x128xbf16>
    %cst_8 = arith.constant dense<0.000000e+00> : vector<8x128xf32>
    %11 = tpu.matmul %9, %10, %cst_8 {dimension_numbers = #tpu.dot_dimension_numbers<[1], [0], [0], [1], [0, 0, 1, 1], [], []>} : vector<8x512xbf16>, vector<512x128xbf16>, vector<8x128xf32> -> vector<8x128xf32>
    %c0_9 = arith.constant 0 : index
    %c0_10 = arith.constant 0 : index
    %12 = vector.load %arg5[%c0_9, %c0_10] : memref<1x128xf32, #tpu.memory_space<vmem>>, vector<1x128xf32>
    %13 = vector.broadcast %12 : vector<1x128xf32> to vector<8x128xf32>
    %14 = arith.addf %11, %13 : vector<8x128xf32>
    %15 = arith.truncf %14 : vector<8x128xf32> to vector<8x128xbf16>
    %c0_11 = arith.constant 0 : index
    %c0_12 = arith.constant 0 : index
    %16 = vector.load %arg6[%c0_11, %c0_12] : memref<128x512xbf16, #tpu.memory_space<vmem>>, vector<128x512xbf16>
    %cst_13 = arith.constant dense<0.000000e+00> : vector<8x512xf32>
    %17 = tpu.matmul %15, %16, %cst_13 {dimension_numbers = #tpu.dot_dimension_numbers<[1], [0], [0], [1], [0, 0, 1, 1], [], []>} : vector<8x128xbf16>, vector<128x512xbf16>, vector<8x512xf32> -> vector<8x512xf32>
    %c0_14 = arith.constant 0 : index
    %c0_15 = arith.constant 0 : index
    %18 = vector.load %arg7[%c0_14, %c0_15] : memref<1x512xf32, #tpu.memory_space<vmem>>, vector<1x512xf32>
    %19 = vector.broadcast %18 : vector<1x512xf32> to vector<8x512xf32>
    %20 = arith.addf %17, %19 : vector<8x512xf32>
    %cst_16 = arith.constant 0.000000e+00 : f32
    %21 = vector.broadcast %cst_16 : f32 to vector<8x512xf32>
    %22 = arith.maximumf %20, %21 : vector<8x512xf32>
    %23 = arith.truncf %22 : vector<8x512xf32> to vector<8x512xbf16>
    %c0_17 = arith.constant 0 : index
    %c0_18 = arith.constant 0 : index
    %24 = vector.load %arg8[%c0_17, %c0_18] : memref<512x256xbf16, #tpu.memory_space<vmem>>, vector<512x256xbf16>
    %cst_19 = arith.constant dense<0.000000e+00> : vector<8x256xf32>
    %25 = tpu.matmul %23, %24, %cst_19 {dimension_numbers = #tpu.dot_dimension_numbers<[1], [0], [0], [1], [0, 0, 1, 1], [], []>} : vector<8x512xbf16>, vector<512x256xbf16>, vector<8x256xf32> -> vector<8x256xf32>
    %c0_20 = arith.constant 0 : index
    %c0_21 = arith.constant 0 : index
    %26 = vector.load %arg9[%c0_20, %c0_21] : memref<1x256xf32, #tpu.memory_space<vmem>>, vector<1x256xf32>
    %27 = vector.broadcast %26 : vector<1x256xf32> to vector<8x256xf32>
    %28 = arith.addf %25, %27 : vector<8x256xf32>
    %c0_22 = arith.constant 0 : index
    %c0_23 = arith.constant 0 : index
    %29 = vector.load %arg10[%c0_22, %c0_23] : memref<8x256xf32, #tpu.memory_space<vmem>>, vector<8x256xf32>
    tpu.vector_store %arg10[%c0_22, %c0_23], %28 {strides = array<i32>} : memref<8x256xf32, #tpu.memory_space<vmem>>, vector<8x256xf32>,
    return
  }
  func.func @transform_0(%arg0: i32) -> (i32, i32) {
    %c0_i32 = arith.constant 0 : i32
    %c0_i32_0 = arith.constant 0 : i32
    return %arg0, %c0_i32 : i32, i32
  }
  func.func @transform_1(%arg0: i32) -> (i32, i32) {
    %c0_i32 = arith.constant 0 : i32
    %c0_i32_0 = arith.constant 0 : i32
    %c0_i32_1 = arith.constant 0 : i32
    return %c0_i32, %c0_i32_0 : i32, i32
  }
  func.func @transform_2(%arg0: i32) -> (i32, i32) {
    %c0_i32 = arith.constant 0 : i32
    %c0_i32_0 = arith.constant 0 : i32
    %c0_i32_1 = arith.constant 0 : i32
    return %c0_i32, %c0_i32_0 : i32, i32
  }
  func.func @transform_3(%arg0: i32) -> (i32, i32) {
    %c0_i32 = arith.constant 0 : i32
    %c0_i32_0 = arith.constant 0 : i32
    %c0_i32_1 = arith.constant 0 : i32
    return %c0_i32, %c0_i32_0 : i32, i32
  }
  func.func @transform_4(%arg0: i32) -> (i32, i32) {
    %c0_i32 = arith.constant 0 : i32
    %c0_i32_0 = arith.constant 0 : i32
    %c0_i32_1 = arith.constant 0 : i32
    return %c0_i32, %c0_i32_0 : i32, i32
  }
  func.func @transform_5(%arg0: i32) -> (i32, i32) {
    %c0_i32 = arith.constant 0 : i32
    %c0_i32_0 = arith.constant 0 : i32
    %c0_i32_1 = arith.constant 0 : i32
    return %c0_i32, %c0_i32_0 : i32, i32
  }
  func.func @transform_6(%arg0: i32) -> (i32, i32) {
    %c0_i32 = arith.constant 0 : i32
    %c0_i32_0 = arith.constant 0 : i32
    %c0_i32_1 = arith.constant 0 : i32
    return %c0_i32, %c0_i32_0 : i32, i32
  }
  func.func @transform_7(%arg0: i32) -> (i32, i32) {
    %c0_i32 = arith.constant 0 : i32
    %c0_i32_0 = arith.constant 0 : i32
    %c0_i32_1 = arith.constant 0 : i32
    return %c0_i32, %c0_i32_0 : i32, i32
  }
  func.func @transform_8(%arg0: i32) -> (i32, i32) {
    %c0_i32 = arith.constant 0 : i32
    %c0_i32_0 = arith.constant 0 : i32
    %c0_i32_1 = arith.constant 0 : i32
    return %c0_i32, %c0_i32_0 : i32, i32
  }
  func.func @transform_9(%arg0: i32) -> (i32, i32) {
    %c0_i32 = arith.constant 0 : i32
    %c0_i32_0 = arith.constant 0 : i32
    return %arg0, %c0_i32 : i32, i32
  }
}

</mosaic_0001>

<bundles_post_ra>
// kernel: autoencoder_forward.1
= control target key start
LH: loop header
LB: loop body
LE: loop exit
PB: predicated region body
PF: predicated region fallthrough
CT: control target
= control target key end

     0   :  { %14 = vsyncpa [#allocation3], 0  ;;  %s2555_s0 = inlined_call_operand.hbm [shape: f32[8,256], index: 0, kind: input, shape index: {}]   ;;  %s2556_s1 = inlined_call_operand.hbm [shape: bf16[256,512], index: 1, kind: input, shape index: {}]   ;;  %s2557_s2 = inlined_call_operand.hbm [shape: f32[1,512], index: 2, kind: input, shape index: {}]   ;;  %s2558_s3 = inlined_call_operand.hbm [shape: bf16[512,128], index: 3, kind: input, shape index: {}]   ;;  %s2559_s4 = inlined_call_operand.vmem [shape: f32[1,128], index: 4, kind: input, shape index: {}]   ;;  %s2560_s5 = inlined_call_operand.hbm [shape: bf16[128,512], index: 5, kind: input, shape index: {}]   ;;  %s2561_s6 = inlined_call_operand.vmem [shape: f32[1,512], index: 6, kind: input, shape index: {}]   ;;  %s2562_s7 = inlined_call_operand.hbm [shape: bf16[512,256], index: 7, kind: input, shape index: {}]   ;;  %s2563_s8 = inlined_call_operand.vmem [shape: f32[1,256], index: 8, kind: input, shape index: {}]   ;;  %s2564_s9 = inlined_call_operand.hbm [shape: f32[8,256], index: 9, kind: output, shape index: {}]  }
   0x1   :  { %15 = vsyncpa [#allocation6], 0 }
   0x2   :  { %16 = vsyncpa [#allocation9], 0 }
   0x3   :  { %17 = vsyncpa [#allocation12], 0 }
   0x4   :  { %18 = vsyncpa [#allocation4], 0  ;;  %s2431_s30 = smov [#allocation5]  }
   0x5   :  { %s34_s10 = sshll.u32 %s2431_s30, 4  ;;  %s35_s10 = int_to_ptr.vmem [resolvable:$true] %s34_s10 }
   0x6   :  { %s2289_s11 = scalar_lea.vmem %s35_s10, 8192  ;;  %p2294_p1 = scmp.lt.s32.totalorder %s35_s10, %s35_s10 }
   0x7   :  { %p2290_p0 = scmp.ne.s32.totalorder %s35_s10, %s2289_s11  ;;  %p2295_p2 = scmp.lt.s32.totalorder %s2289_s11, %s2289_s11 }
   0x9   :  { %p2296_p3 = por %p2295_p2, %p2294_p1 }
   0xb   :  { %p2297_p4 = pnand %p2296_p3, %p2290_p0 }
   0xd   :  { %2300 = shalt.err (!%p2297_p4)
}
   0xe   :  { %s2432_s12 = smov 256   ;;  %s2433_s13 = smov 16  }
   0xf   :  { %40 = dma.hbm_to_vmem [thread:$0]  %s2556_s1, 8192, %s35_s10, [#allocation6], %s2432_s12, %s2432_s12, %s2433_s13  }
  0x10   :  { %s2434_s16 = smov [#allocation8]  }
  0x11   :  { %s56_s17 = sshll.u32 %s2434_s16, 4  ;;  %s57_s17 = int_to_ptr.vmem [resolvable:$true] %s56_s17 }
  0x12   :  { %s2309_s18 = scalar_lea.vmem %s57_s17, 4096  ;;  %p2314_p6 = scmp.lt.s32.totalorder %s57_s17, %s57_s17 }
  0x13   :  { %p2310_p5 = scmp.ne.s32.totalorder %s57_s17, %s2309_s18  ;;  %p2315_p7 = scmp.lt.s32.totalorder %s2309_s18, %s2309_s18 }
  0x15   :  { %p2316_p8 = por %p2315_p7, %p2314_p6 }
  0x17   :  { %p2317_p9 = pnand %p2316_p8, %p2310_p5 }
  0x19   :  { %2320 = shalt.err (!%p2317_p9)
}
  0x1a   :  { %s2435_s19 = smov 64   ;;  %s2436_s20 = smov 4  }
  0x1b   :  { %62 = dma.hbm_to_vmem [thread:$0]  %s2558_s3, 4096, %s57_s17, [#allocation9], %s2435_s19, %s2435_s19, %s2436_s20  }
  0x1c   :  { %s2437_s23 = smov [#allocation2]   ;;  %s2438_s25 = smov [#allocation7]  }
  0x1d   :  { %s25_s24 = sshll.u32 %s2437_s23, 4  ;;  %s47_s1 = sshll.u32 %s2438_s25, 4  ;;  %s26_s24 = int_to_ptr.vmem [resolvable:$true] %s25_s24  ;;  %s48_s1 = int_to_ptr.vmem [resolvable:$true] %s47_s1 }
  0x1e   :  { %s2329_s26 = scalar_lea.vmem %s26_s24, 256  ;;  %p2334_p11 = scmp.lt.s32.totalorder %s26_s24, %s26_s24 }
  0x1f   :  { %p2330_p10 = scmp.ne.s32.totalorder %s26_s24, %s2329_s26  ;;  %p2335_p12 = scmp.lt.s32.totalorder %s2329_s26, %s2329_s26 }
  0x21   :  { %p2336_p13 = por %p2335_p12, %p2334_p11 }
  0x23   :  { %p2337_p0 = pnand %p2336_p13, %p2330_p10 }
  0x25   :  { %2340 = shalt.err (!%p2337_p0)
}
  0x26   :  { %28 = dma.hbm_to_vmem [thread:$0]  %s2555_s0, 256, %s26_s24, [#allocation3]  }
  0x27   :  { %s2349_s29 = scalar_lea.vmem %s48_s1, 64  ;;  %p2354_p2 = scmp.lt.s32.totalorder %s48_s1, %s48_s1 }
  0x28   :  { %p2350_p1 = scmp.ne.s32.totalorder %s48_s1, %s2349_s29  ;;  %p2355_p3 = scmp.lt.s32.totalorder %s2349_s29, %s2349_s29 }
  0x2a   :  { %p2356_p4 = por %p2355_p3, %p2354_p2 }
  0x2c   :  { %p2357_p5 = pnand %p2356_p4, %p2350_p1 }
  0x2e   :  { %2360 = shalt.err (!%p2357_p5)
}
  0x2f   :  { %50 = dma.hbm_to_vmem [thread:$0]  %s2557_s2, 64, %s48_s1, [#allocation6]  }
  0x30   :  { %s2439_s10 = smov [#allocation10]   ;;  %s2440_s14 = smov [#allocation11]  }
  0x31   :  { %s70_s11 = sshll.u32 %s2439_s10, 4  ;;  %s84_s15 = sshll.u32 %s2440_s14, 4  ;;  %s71_s11 = int_to_ptr.vmem [resolvable:$true] %s70_s11  ;;  %s85_s15 = int_to_ptr.vmem [resolvable:$true] %s84_s15 }
  0x32   :  { %s2369_s16 = scalar_lea.vmem %s71_s11, 4096  ;;  %p2374_p7 = scmp.lt.s32.totalorder %s71_s11, %s71_s11 }
  0x33   :  { %p2370_p6 = scmp.ne.s32.totalorder %s71_s11, %s2369_s16  ;;  %p2375_p8 = scmp.lt.s32.totalorder %s2369_s16, %s2369_s16 }
  0x35   :  { %p2376_p9 = por %p2375_p8, %p2374_p7 }
  0x37   :  { %p2377_p10 = pnand %p2376_p9, %p2370_p6 }
  0x39   :  { %2380 = shalt.err (!%p2377_p10)
}
  0x3a   :  { %76 = dma.hbm_to_vmem [thread:$0]  %s2560_s5, 4096, %s71_s11, [#allocation9], %s2432_s12, %s2432_s12, %s2433_s13  }
  0x3b   :  { %s2389_s2 = scalar_lea.vmem %s85_s15, 8192  ;;  %p2394_p12 = scmp.lt.s32.totalorder %s85_s15, %s85_s15 }
  0x3c   :  { %p2390_p11 = scmp.ne.s32.totalorder %s85_s15, %s2389_s2  ;;  %p2395_p13 = scmp.lt.s32.totalorder %s2389_s2, %s2389_s2 }
  0x3e   :  { %p2396_p0 = por %p2395_p13, %p2394_p12 }
  0x40   :  { %p2397_p1 = pnand %p2396_p0, %p2390_p11 }
  0x42   :  { %2400 = shalt.err (!%p2397_p1)
}
  0x43   :  { %s2441_s18 = smov 128   ;;  %s2442_s19 = smov 8  }
  0x44   :  { %90 = dma.hbm_to_vmem [thread:$0]  %s2562_s7, 8192, %s85_s15, [#allocation12], %s2441_s18, %s2441_s18, %s2442_s19  }
  0x45   :  { %2421 = dma.done.wait [#allocation3], 256  }
  0x46   :  { %2422 = vsyncadd [#allocation3], 4294967040 }
  0x47   :  { %2423 = dma.done.wait [#allocation6], 8256  }
  0x48   :  { %2424 = vsyncadd [#allocation6], 4294959040 }
  0x49   :  { %2425 = dma.done.wait [#allocation9], 8192  }
  0x4a   :  { %2426 = vsyncadd [#allocation9], 4294959104 }
  0x4b   :  { %2427 = dma.done.wait [#allocation12], 8192  }
  0x4c   :  { %2428 = vsyncadd [#allocation12], 4294959104  ;;  %v2009_v0 = vld [vmem:[#allocation5 + $0xe4] ss:$16 sps:$4 sm:$0xff]   ;;  %v2011_v1 = vld [vmem:[#allocation5 + $0xec] ss:$16 sps:$4 sm:$0xff]  }
  0x4d   :  { %522 = vmatprep.subr.bf16.mxu0 %v2009_v0  ;;  %v2013_v2 = vld [vmem:[#allocation5 + $0xe0] ss:$16 sps:$4 sm:$0xff]   ;;  %v2014_v3 = vld [vmem:[#allocation5 + $0xe8] ss:$16 sps:$4 sm:$0xff]   ;;  %563 = vmatprep.subr.bf16.mxu1 %v2011_v1  ;;  %v2015_v4 = vld [vmem:[#allocation5 + $0xc4] ss:$16 sps:$4 sm:$0xff]  }
  0x4e   :  { %523 = vmatpush1.bf16.msra.mxu0 %v2013_v2  ;;  %564 = vmatpush1.bf16.msra.mxu1 %v2014_v3  ;;  %v2017_v5 = vld [vmem:[#allocation5 + $0xcc] ss:$16 sps:$4 sm:$0xff]   ;;  %v2019_v6 = vld [vmem:[#allocation5 + $0xc0] ss:$16 sps:$4 sm:$0xff]   ;;  %v2020_v7 = vld [vmem:[#allocation5 + $0xc8] ss:$16 sps:$4 sm:$0xff]  }
  0x4f   :  { %524 = vmatprep.subr.bf16.mxu0 %v2015_v4  ;;  %565 = vmatprep.subr.bf16.mxu1 %v2017_v5  ;;  %v2021_v8 = vld [vmem:[#allocation5 + $0xa4] ss:$16 sps:$4 sm:$0xff]   ;;  %v2023_v9 = vld [vmem:[#allocation5 + $0xac] ss:$16 sps:$4 sm:$0xff]   ;;  %v2025_v10 = vld [vmem:[#allocation5 + $0xa0] ss:$16 sps:$4 sm:$0xff]  }
  0x50   :  { %v2026_v11 = vld [vmem:[#allocation5 + $0xa8] ss:$16 sps:$4 sm:$0xff]   ;;  %v2027_v12 = vld [vmem:[#allocation5 + $0x84] ss:$16 sps:$4 sm:$0xff]   ;;  %v2029_v13 = vld [vmem:[#allocation5 + $0x8c] ss:$16 sps:$4 sm:$0xff]  }
  0x51   :  { %v2031_v14 = vld [vmem:[#allocation5 + $0x80] ss:$16 sps:$4 sm:$0xff]   ;;  %v2032_v15 = vld [vmem:[#allocation5 + $0x88] ss:$16 sps:$4 sm:$0xff]   ;;  %v2033_v16 = vld [vmem:[#allocation5 + $0x64] ss:$16 sps:$4 sm:$0xff]  }
  0x52   :  { %525 = vmatpush1.bf16.msra.mxu0 %v2019_v6  ;;  %566 = vmatpush1.bf16.msra.mxu1 %v2020_v7  ;;  %v2035_v17 = vld [vmem:[#allocation5 + $0x6c] ss:$16 sps:$4 sm:$0xff]   ;;  %v2037_v18 = vld [vmem:[#allocation5 + $0x60] ss:$16 sps:$4 sm:$0xff]   ;;  %v2038_v19 = vld [vmem:[#allocation5 + $0x68] ss:$16 sps:$4 sm:$0xff]  }
  0x53   :  { %526 = vmatprep.subr.bf16.mxu0 %v2021_v8  ;;  %567 = vmatprep.subr.bf16.mxu1 %v2023_v9  ;;  %v2039_v20 = vld [vmem:[#allocation5 + $0x44] ss:$16 sps:$4 sm:$0xff]   ;;  %v2041_v21 = vld [vmem:[#allocation5 + $0x4c] ss:$16 sps:$4 sm:$0xff]   ;;  %v2043_v22 = vld [vmem:[#allocation5 + $0x40] ss:$16 sps:$4 sm:$0xff]  }
  0x54   :  { %v2044_v23 = vld [vmem:[#allocation5 + $0x48] ss:$16 sps:$4 sm:$0xff]   ;;  %v2045_v24 = vld [vmem:[#allocation5 + $0x24] ss:$16 sps:$4 sm:$0xff]   ;;  %v2047_v25 = vld [vmem:[#allocation5 + $0x2c] ss:$16 sps:$4 sm:$0xff]  }
  0x55   :  { %v2049_v26 = vld [vmem:[#allocation5 + $0x20] ss:$16 sps:$4 sm:$0xff]   ;;  %v2050_v27 = vld [vmem:[#allocation5 + $0x28] ss:$16 sps:$4 sm:$0xff]   ;;  %v2051_v28 = vld [vmem:[#allocation5 + $0x4] ss:$16 sps:$4 sm:$0xff]  }
  0x56   :  { %527 = vmatpush1.bf16.msra.mxu0 %v2025_v10  ;;  %568 = vmatpush1.bf16.msra.mxu1 %v2026_v11  ;;  %v2053_v29 = vld [vmem:[#allocation5 + $0xc] ss:$16 sps:$4 sm:$0xff]   ;;  %v2055_v30 = vld [vmem:[#allocation5] ss:$16 sps:$4 sm:$0xff]   ;;  %v2056_v31 = vld [vmem:[#allocation5 + $0x8] ss:$16 sps:$4 sm:$0xff]  }
  0x57   :  { %528 = vmatprep.subr.bf16.mxu0 %v2027_v12  ;;  %569 = vmatprep.subr.bf16.mxu1 %v2029_v13  ;;  %v2057_v32 = vld [vmem:[#allocation5 + $0x1e4] ss:$16 sps:$4 sm:$0xff]   ;;  %v2059_v33 = vld [vmem:[#allocation5 + $0x1ec] ss:$16 sps:$4 sm:$0xff]   ;;  %v2061_v34 = vld [vmem:[#allocation5 + $0x1e0] ss:$16 sps:$4 sm:$0xff]  }
  0x58   :  { %v2062_v35 = vld [vmem:[#allocation5 + $0x1e8] ss:$16 sps:$4 sm:$0xff]   ;;  %v2063_v36 = vld [vmem:[#allocation5 + $0x1c4] ss:$16 sps:$4 sm:$0xff]   ;;  %v2065_v37 = vld [vmem:[#allocation5 + $0x1cc] ss:$16 sps:$4 sm:$0xff]  }
  0x59   :  { %v2067_v38 = vld [vmem:[#allocation5 + $0x1c0] ss:$16 sps:$4 sm:$0xff]   ;;  %v2068_v39 = vld [vmem:[#allocation5 + $0x1c8] ss:$16 sps:$4 sm:$0xff]   ;;  %v2069_v40 = vld [vmem:[#allocation5 + $0x1a4] ss:$16 sps:$4 sm:$0xff]  }
  0x5a   :  { %529 = vmatpush1.bf16.msra.mxu0 %v2031_v14  ;;  %570 = vmatpush1.bf16.msra.mxu1 %v2032_v15  ;;  %v2071_v41 = vld [vmem:[#allocation5 + $0x1ac] ss:$16 sps:$4 sm:$0xff]   ;;  %v2073_v42 = vld [vmem:[#allocation5 + $0x1a0] ss:$16 sps:$4 sm:$0xff]   ;;  %v2074_v43 = vld [vmem:[#allocation5 + $0x1a8] ss:$16 sps:$4 sm:$0xff]  }
  0x5b   :  { %530 = vmatprep.subr.bf16.mxu0 %v2033_v16  ;;  %571 = vmatprep.subr.bf16.mxu1 %v2035_v17  ;;  %v2075_v44 = vld [vmem:[#allocation5 + $0x184] ss:$16 sps:$4 sm:$0xff]   ;;  %v2077_v45 = vld [vmem:[#allocation5 + $0x18c] ss:$16 sps:$4 sm:$0xff]   ;;  %v2079_v46 = vld [vmem:[#allocation5 + $0x180] ss:$16 sps:$4 sm:$0xff]  }
  0x5c   :  { %v113_v47 = vld [vmem:[#allocation2 + $0x8] sm:$0xff]  ;;  %v2081_v50 = vld [vmem:[#allocation5 + $0x164] ss:$16 sps:$4 sm:$0xff]   ;;  %v2085_v52 = vld [vmem:[#allocation5 + $0x160] ss:$16 sps:$4 sm:$0xff]   ;;  %s2444_s22 = smov [#allocation13]  }
  0x5d   :  { %v2080_v48 = vld [vmem:[#allocation5 + $0x188] ss:$16 sps:$4 sm:$0xff]   ;;  %v115_v49 = vpack.c.bf16 %v113_v47, %v113_v47  ;;  %v2083_v51 = vld [vmem:[#allocation5 + $0x16c] ss:$16 sps:$4 sm:$0xff]   ;;  %v2087_v54 = vld [vmem:[#allocation5 + $0x144] ss:$16 sps:$4 sm:$0xff]  }
  0x5e   :  { %531 = vmatpush1.bf16.msra.mxu0 %v2037_v18  ;;  %572 = vmatpush1.bf16.msra.mxu1 %v2038_v19  ;;  %v2086_v53 = vld [vmem:[#allocation5 + $0x168] ss:$16 sps:$4 sm:$0xff]   ;;  %v2089_v55 = vld [vmem:[#allocation5 + $0x14c] ss:$16 sps:$4 sm:$0xff]   ;;  %v2091_v56 = vld [vmem:[#allocation5 + $0x140] ss:$16 sps:$4 sm:$0xff]  }
  0x5f   :  { %532 = vmatprep.subr.bf16.mxu0 %v2039_v20  ;;  %573 = vmatprep.subr.bf16.mxu1 %v2041_v21  ;;  %v2092_v57 = vld [vmem:[#allocation5 + $0x148] ss:$16 sps:$4 sm:$0xff]   ;;  %v2093_v58 = vld [vmem:[#allocation5 + $0x124] ss:$16 sps:$4 sm:$0xff]   ;;  %v2095_v59 = vld [vmem:[#allocation5 + $0x12c] ss:$16 sps:$4 sm:$0xff]  }
  0x60   :  { %554 = vmatprep.mubr.bf16.mxu0 %v115_v49  ;;  %595 = vmatprep.mubr.bf16.mxu1 %v115_v49  ;;  %v2097_v60 = vld [vmem:[#allocation5 + $0x120] ss:$16 sps:$4 sm:$0xff]   ;;  %v2098_v61 = vld [vmem:[#allocation5 + $0x128] ss:$16 sps:$4 sm:$0xff]   ;;  %v2099_v62 = vld [vmem:[#allocation5 + $0x104] ss:$16 sps:$4 sm:$0xff]  }
  0x61   :  { %v2101_v63 = vld [vmem:[#allocation5 + $0x10c] ss:$16 sps:$4 sm:$0xff]   ;;  %v2103_v0 = vld [vmem:[#allocation5 + $0x100] ss:$16 sps:$4 sm:$0xff]   ;;  %v2104_v1 = vld [vmem:[#allocation5 + $0x108] ss:$16 sps:$4 sm:$0xff]  }
  0x62   :  { %533 = vmatpush1.bf16.msra.mxu0 %v2043_v22  ;;  %574 = vmatpush1.bf16.msra.mxu1 %v2044_v23  ;;  %v112_v2 = vld [vmem:[#allocation2] sm:$0xff]  ;;  %v2105_v3 = vld [vmem:[#allocation8 + $0x78] sm:$0xff]   ;;  %v2117_v16 = vld [vmem:[#allocation8 + $0x60] sm:$0xff]   ;;  %s1746_s23 = sshll.u32 %s2444_s22, 4  ;;  %s1747_s23 = int_to_ptr.vmem [resolvable:$true] %s1746_s23 }
  0x63   :  { %534 = vmatprep.subr.bf16.mxu0 %v2045_v24  ;;  %575 = vmatprep.subr.bf16.mxu1 %v2047_v25  ;;  %v2106_v4 = vld [vmem:[#allocation8 + $0xf8] sm:$0xff]   ;;  %v114_v6 = vpack.c.bf16 %v112_v2, %v112_v2  ;;  %v2109_v8 = vld [vmem:[#allocation8 + $0x70] sm:$0xff]   ;;  %v2113_v12 = vld [vmem:[#allocation8 + $0x68] sm:$0xff]   ;;  %p2406_p3 = scmp.lt.s32.totalorder %s1747_s23, %s1747_s23 }
  0x64   :  { %v2107_v5 = vld [vmem:[#allocation8 + $0x38] sm:$0xff]   ;;  %v2110_v9 = vld [vmem:[#allocation8 + $0xf0] sm:$0xff]   ;;  %v2114_v13 = vld [vmem:[#allocation8 + $0xe8] sm:$0xff]  }
  0x65   :  { %v2108_v7 = vld [vmem:[#allocation8 + $0xb8] sm:$0xff]   ;;  %v2111_v10 = vld [vmem:[#allocation8 + $0x30] sm:$0xff]   ;;  %v2115_v14 = vld [vmem:[#allocation8 + $0x28] sm:$0xff]  }
  0x66   :  { %535 = vmatpush1.bf16.msra.mxu0 %v2049_v26  ;;  %576 = vmatpush1.bf16.msra.mxu1 %v2050_v27  ;;  %v2112_v11 = vld [vmem:[#allocation8 + $0xb0] sm:$0xff]   ;;  %v2116_v15 = vld [vmem:[#allocation8 + $0xa8] sm:$0xff]   ;;  %v2118_v17 = vld [vmem:[#allocation8 + $0xe0] sm:$0xff]  }
  0x67   :  { %536 = vmatprep.subr.bf16.mxu0 %v2051_v28  ;;  %577 = vmatprep.subr.bf16.mxu1 %v2053_v29  ;;  %v2119_v18 = vld [vmem:[#allocation8 + $0x20] sm:$0xff]   ;;  %v2121_v20 = vld [vmem:[#allocation8 + $0x58] sm:$0xff]   ;;  %v2125_v24 = vld [vmem:[#allocation8 + $0x50] sm:$0xff]  }
  0x68   :  { %v2120_v19 = vld [vmem:[#allocation8 + $0xa0] sm:$0xff]   ;;  %v2122_v21 = vld [vmem:[#allocation8 + $0xd8] sm:$0xff]   ;;  %v2126_v25 = vld [vmem:[#allocation8 + $0xd0] sm:$0xff]  }
  0x69   :  { %v2123_v22 = vld [vmem:[#allocation8 + $0x18] sm:$0xff]   ;;  %v2127_v26 = vld [vmem:[#allocation8 + $0x10] sm:$0xff]   ;;  %v2129_v28 = vld [vmem:[#allocation8 + $0x48] sm:$0xff]  }
  0x6a   :  { %537 = vmatpush1.bf16.msra.mxu0 %v2055_v30  ;;  %578 = vmatpush1.bf16.msra.mxu1 %v2056_v31  ;;  %v2124_v23 = vld [vmem:[#allocation8 + $0x98] sm:$0xff]   ;;  %v2128_v27 = vld [vmem:[#allocation8 + $0x90] sm:$0xff]   ;;  %v2130_v29 = vld [vmem:[#allocation8 + $0xc8] sm:$0xff]  }
  0x6b   :  { %538 = vmatprep.subr.bf16.mxu0 %v2057_v32  ;;  %579 = vmatprep.subr.bf16.mxu1 %v2059_v33  ;;  %v2131_v30 = vld [vmem:[#allocation8 + $0x8] sm:$0xff]   ;;  %v2133_v32 = vld [vmem:[#allocation8 + $0x40] sm:$0xff]  }
  0x6c   :  { %v2132_v31 = vld [vmem:[#allocation8 + $0x88] sm:$0xff]   ;;  %v2134_v33 = vld [vmem:[#allocation8 + $0xc0] sm:$0xff]  }
  0x6e   :  { %539 = vmatpush2.bf16.msra.mxu0 %v2061_v34  ;;  %580 = vmatpush2.bf16.msra.mxu1 %v2062_v35  ;;  %v2135_v34 = vld [vmem:[#allocation8] sm:$0xff]  }
  0x6f   :  { %540 = vmatprep.subr.bf16.mxu0 %v2063_v36  ;;  %581 = vmatprep.subr.bf16.mxu1 %v2065_v37  ;;  %v2136_v35 = vld [vmem:[#allocation8 + $0x80] sm:$0xff]   ;;  %v2142_v37 = vld [vmem:[#allocation10 + $0xec] ss:$16 sps:$4 sm:$0xff]  }
  0x70   :  { %v2139_v36 = vld [vmem:[#allocation10 + $0xe4] ss:$16 sps:$4 sm:$0xff]  }
  0x72   :  { %541 = vmatpush2.bf16.msra.mxu0 %v2067_v38  ;;  %582 = vmatpush2.bf16.msra.mxu1 %v2068_v39  ;;  %v182_v38 = vlaneseq }
  0x73   :  { %542 = vmatprep.subr.bf16.mxu0 %v2069_v40  ;;  %583 = vmatprep.subr.bf16.mxu1 %v2071_v41 }
  0x74   :  { %v2519_v39 = vshrl.u32 %v182_v38, 7 }
  0x76   :  { %543 = vmatpush2.bf16.msra.mxu0 %v2073_v42  ;;  %584 = vmatpush2.bf16.msra.mxu1 %v2074_v43  ;;  %v2522_v40 = vsub.s32 0, %v2519_v39  ;;  %v192_v41 = vsub.s32 2, %v2519_v39  ;;  %v180_v42 = vld [vmem:[#allocation7] sm:$0xf]  ;;  %v2526_v43 = vsub.s32 1, %v2519_v39 }
  0x77   :  { %544 = vmatprep.subr.bf16.mxu0 %v2075_v44  ;;  %585 = vmatprep.subr.bf16.mxu1 %v2077_v45  ;;  %v196_v44 = vsub.s32 3, %v2519_v39 }
  0x78   :  { %v185_v45 = vrot.slane %v180_v42, %v2522_v40  ;;  %v189_v47 = vrot.slane %v180_v42, %v2526_v43 }
  0x7a   :  { %545 = vmatpush2.bf16.msra.mxu0 %v2079_v46  ;;  %586 = vmatpush2.bf16.msra.mxu1 %v2080_v48  ;;  %v193_v46 = vrot.slane %v180_v42, %v192_v41  ;;  %v197_v48 = vrot.slane %v180_v42, %v196_v44 }
  0x7b   :  { %546 = vmatprep.subr.bf16.mxu0 %v2081_v50  ;;  %587 = vmatprep.subr.bf16.mxu1 %v2083_v51 }
  0x7e   :  { %547 = vmatpush2.bf16.msra.mxu0 %v2085_v52  ;;  %588 = vmatpush2.bf16.msra.mxu1 %v2086_v53 }
  0x7f   :  { %548 = vmatprep.subr.bf16.mxu0 %v2087_v54  ;;  %589 = vmatprep.subr.bf16.mxu1 %v2089_v55 }
  0x82   :  { %549 = vmatpush2.bf16.msra.mxu0 %v2091_v56  ;;  %590 = vmatpush2.bf16.msra.mxu1 %v2092_v57 }
  0x83   :  { %550 = vmatprep.subr.bf16.mxu0 %v2093_v58  ;;  %591 = vmatprep.subr.bf16.mxu1 %v2095_v59 }
  0x86   :  { %551 = vmatpush2.bf16.msra.mxu0 %v2097_v60  ;;  %592 = vmatpush2.bf16.msra.mxu1 %v2098_v61 }
  0x87   :  { %552 = vmatprep.subr.bf16.mxu0 %v2099_v62  ;;  %593 = vmatprep.subr.bf16.mxu1 %v2101_v63 }
  0x8a   :  { %553 = vmatpush2.bf16.msra.mxu0 %v2103_v0  ;;  %594 = vmatpush2.bf16.msra.mxu1 %v2104_v1 }
  0x8b   :  { %1951 = vmatprep.subr.bf16.mxu0 %v2105_v3  ;;  %1973 = vmatprep.subr.bf16.mxu1 %v2106_v4  ;;  %v2137_v4 = vld [vmem:[#allocation10 + $0xe0] ss:$16 sps:$4 sm:$0xff]  }
  0x8d   :  { %555 = vmatmul.mubr.bf16.vlgmr.msra.gmra.mxu0 %v114_v6  ;;  %596 = vmatmul.mubr.bf16.vlgmr.msra.gmra.mxu1 %v114_v6 }
  0x8e   :  { %1952 = vmatpush3.bf16.msra.mxu0 %v2107_v5  ;;  %1974 = vmatpush3.bf16.msra.mxu1 %v2108_v7  ;;  %v2140_v5 = vld [vmem:[#allocation10 + $0xe8] ss:$16 sps:$4 sm:$0xff]   ;;  %v2145_v7 = vld [vmem:[#allocation10 + $0xc4] ss:$16 sps:$4 sm:$0xff]  }
  0x8f   :  { %1953 = vmatprep.subr.bf16.mxu0 %v2109_v8  ;;  %1975 = vmatprep.subr.bf16.mxu1 %v2110_v9  ;;  %v2148_v8 = vld [vmem:[#allocation10 + $0xcc] ss:$16 sps:$4 sm:$0xff]   ;;  %v2143_v9 = vld [vmem:[#allocation10 + $0xc0] ss:$16 sps:$4 sm:$0xff]  }
  0x92   :  { %1954 = vmatpush3.bf16.msra.mxu0 %v2111_v10  ;;  %1976 = vmatpush3.bf16.msra.mxu1 %v2112_v11  ;;  %v2146_v10 = vld [vmem:[#allocation10 + $0xc8] ss:$16 sps:$4 sm:$0xff]   ;;  %v2151_v11 = vld [vmem:[#allocation10 + $0xa4] ss:$16 sps:$4 sm:$0xff]  }
  0x93   :  { %1955 = vmatprep.subr.bf16.mxu0 %v2113_v12  ;;  %1977 = vmatprep.subr.bf16.mxu1 %v2114_v13  ;;  %v2154_v12 = vld [vmem:[#allocation10 + $0xac] ss:$16 sps:$4 sm:$0xff]   ;;  %v2149_v13 = vld [vmem:[#allocation10 + $0xa0] ss:$16 sps:$4 sm:$0xff]  }
  0x96   :  { %1956 = vmatpush3.bf16.msra.mxu0 %v2115_v14  ;;  %1978 = vmatpush3.bf16.msra.mxu1 %v2116_v15  ;;  %v2152_v14 = vld [vmem:[#allocation10 + $0xa8] ss:$16 sps:$4 sm:$0xff]   ;;  %v2157_v15 = vld [vmem:[#allocation10 + $0x84] ss:$16 sps:$4 sm:$0xff]  }
  0x97   :  { %1957 = vmatprep.subr.bf16.mxu0 %v2117_v16  ;;  %1979 = vmatprep.subr.bf16.mxu1 %v2118_v17  ;;  %v2160_v16 = vld [vmem:[#allocation10 + $0x8c] ss:$16 sps:$4 sm:$0xff]   ;;  %v2155_v17 = vld [vmem:[#allocation10 + $0x80] ss:$16 sps:$4 sm:$0xff]  }
  0x9a   :  { %1958 = vmatpush3.bf16.msra.mxu0 %v2119_v18  ;;  %1980 = vmatpush3.bf16.msra.mxu1 %v2120_v19  ;;  %v2158_v18 = vld [vmem:[#allocation10 + $0x88] ss:$16 sps:$4 sm:$0xff]   ;;  %v2163_v19 = vld [vmem:[#allocation10 + $0x64] ss:$16 sps:$4 sm:$0xff]  }
  0x9b   :  { %1959 = vmatprep.subr.bf16.mxu0 %v2121_v20  ;;  %1981 = vmatprep.subr.bf16.mxu1 %v2122_v21  ;;  %v2166_v20 = vld [vmem:[#allocation10 + $0x6c] ss:$16 sps:$4 sm:$0xff]   ;;  %v2161_v21 = vld [vmem:[#allocation10 + $0x60] ss:$16 sps:$4 sm:$0xff]  }
  0x9e   :  { %1960 = vmatpush3.bf16.msra.mxu0 %v2123_v22  ;;  %1982 = vmatpush3.bf16.msra.mxu1 %v2124_v23  ;;  %v2164_v22 = vld [vmem:[#allocation10 + $0x68] ss:$16 sps:$4 sm:$0xff]   ;;  %v2169_v23 = vld [vmem:[#allocation10 + $0x44] ss:$16 sps:$4 sm:$0xff]  }
  0x9f   :  { %1961 = vmatprep.subr.bf16.mxu0 %v2125_v24  ;;  %1983 = vmatprep.subr.bf16.mxu1 %v2126_v25  ;;  %v2172_v24 = vld [vmem:[#allocation10 + $0x4c] ss:$16 sps:$4 sm:$0xff]   ;;  %v2167_v25 = vld [vmem:[#allocation10 + $0x40] ss:$16 sps:$4 sm:$0xff]  }
  0xa2   :  { %1962 = vmatpush3.bf16.msra.mxu0 %v2127_v26  ;;  %1984 = vmatpush3.bf16.msra.mxu1 %v2128_v27  ;;  %v2170_v26 = vld [vmem:[#allocation10 + $0x48] ss:$16 sps:$4 sm:$0xff]   ;;  %v2175_v27 = vld [vmem:[#allocation10 + $0x24] ss:$16 sps:$4 sm:$0xff]  }
  0xa3   :  { %1963 = vmatprep.subr.bf16.mxu0 %v2129_v28  ;;  %1985 = vmatprep.subr.bf16.mxu1 %v2130_v29  ;;  %v2178_v28 = vld [vmem:[#allocation10 + $0x2c] ss:$16 sps:$4 sm:$0xff]   ;;  %v2173_v29 = vld [vmem:[#allocation10 + $0x20] ss:$16 sps:$4 sm:$0xff]  }
  0xa6   :  { %1964 = vmatpush3.bf16.msra.mxu0 %v2131_v30  ;;  %1986 = vmatpush3.bf16.msra.mxu1 %v2132_v31  ;;  %v2176_v30 = vld [vmem:[#allocation10 + $0x28] ss:$16 sps:$4 sm:$0xff]   ;;  %v2181_v31 = vld [vmem:[#allocation10 + $0x4] ss:$16 sps:$4 sm:$0xff]  }
  0xa7   :  { %1965 = vmatprep.subr.bf16.mxu0 %v2133_v32  ;;  %1987 = vmatprep.subr.bf16.mxu1 %v2134_v33  ;;  %v2184_v32 = vld [vmem:[#allocation10 + $0xc] ss:$16 sps:$4 sm:$0xff]   ;;  %v2179_v33 = vld [vmem:[#allocation10] ss:$16 sps:$4 sm:$0xff]  }
  0xaa   :  { %1966 = vmatpush3.bf16.msra.mxu0 %v2135_v34  ;;  %1988 = vmatpush3.bf16.msra.mxu1 %v2136_v35  ;;  %v2182_v34 = vld [vmem:[#allocation10 + $0x8] ss:$16 sps:$4 sm:$0xff]   ;;  %v2443_v35 = vmov 0  }
  0xab   :  { %1170 = vmatprep.subr.bf16.mxu0 %v2139_v36  ;;  %1211 = vmatprep.subr.bf16.mxu1 %v2142_v37  ;;  %v2187_v36 = vld [vmem:[#allocation11 + $0x74] ss:$8 sps:$4 sm:$0xff]  }
  0xac   :  { %v2190_v37 = vld [vmem:[#allocation11 + $0x174] ss:$8 sps:$4 sm:$0xff]  }
 0x14d   :  { %v556_v49 = vpop.f32.mrf.mxu0  ;;  %v597_v50 = vpop.f32.mrf.mxu1 }
 0x14e   :  { %v557_v51 = vadd.f32 %v556_v49, %v185_v45  ;;  %v598_v52 = vadd.f32 %v597_v50, %v193_v46  ;;  %v1822_v45 = vld [vmem:[%s2559_s4] ss:$0 sm:$0xff] }
 0x14f   :  { %v558_v53 = vpop.f32.mrf.mxu0  ;;  %v599_v54 = vpop.f32.mrf.mxu1 }
 0x150   :  { %v606_v55 = vmax.f32 %v598_v52, 0.0  ;;  %v559_v56 = vadd.f32 %v558_v53, %v189_v47  ;;  %v600_v57 = vadd.f32 %v599_v54, %v197_v48  ;;  %v604_v58 = vmax.f32 %v557_v51, 0.0 }
 0x151   :  { %v560_v59 = vpop.f32.mrf.mxu0  ;;  %v601_v60 = vpop.f32.mrf.mxu1 }
 0x152   :  { %v605_v61 = vmax.f32 %v559_v56, 0.0  ;;  %v607_v62 = vmax.f32 %v600_v57, 0.0  ;;  %v610_v63 = vpack.c.bf16 %v606_v55, %v606_v55  ;;  %v608_v6 = vpack.c.bf16 %v604_v58, %v604_v58  ;;  %v2185_v56 = vld [vmem:[#allocation11 + $0x70] ss:$8 sps:$4 sm:$0xff]   ;;  %v2193_v59 = vld [vmem:[#allocation11 + $0x64] ss:$8 sps:$4 sm:$0xff]  }
 0x153   :  { %v561_v0 = vpop.f32.mrf.mxu0  ;;  %v602_v1 = vpop.f32.mrf.mxu1  ;;  %v2188_v57 = vld [vmem:[#allocation11 + $0x170] ss:$8 sps:$4 sm:$0xff]   ;;  %v2196_v60 = vld [vmem:[#allocation11 + $0x164] ss:$8 sps:$4 sm:$0xff]  }
 0x154   :  { %v609_v2 = vpack.c.bf16 %v605_v61, %v605_v61  ;;  %v611_v3 = vpack.c.bf16 %v607_v62, %v607_v62  ;;  %v2191_v61 = vld [vmem:[#allocation11 + $0x60] ss:$8 sps:$4 sm:$0xff]   ;;  %v2202_v0 = vld [vmem:[#allocation11 + $0x154] ss:$8 sps:$4 sm:$0xff]   ;;  %v2197_v1 = vld [vmem:[#allocation11 + $0x50] ss:$8 sps:$4 sm:$0xff]  }
 0x155   :  { %v2194_v62 = vld [vmem:[#allocation11 + $0x160] ss:$8 sps:$4 sm:$0xff]  }
 0x156   :  { %907 = vmatprep.mubr.bf16.mxu0 %v609_v2  ;;  %947 = vmatprep.mubr.bf16.mxu1 %v611_v3  ;;  %v2200_v2 = vld [vmem:[#allocation11 + $0x150] ss:$8 sps:$4 sm:$0xff]   ;;  %v2205_v3 = vld [vmem:[#allocation11 + $0x44] ss:$8 sps:$4 sm:$0xff]  }
 0x157   :  { %908 = vmatmul.mubr.bf16.vlgmr.msra.gmra.mxu0 %v608_v6  ;;  %948 = vmatmul.mubr.bf16.vlgmr.msra.gmra.mxu1 %v610_v63  ;;  %v2199_v63 = vld [vmem:[#allocation11 + $0x54] ss:$8 sps:$4 sm:$0xff]   ;;  %v2206_v6 = vld [vmem:[#allocation11 + $0x140] ss:$8 sps:$4 sm:$0xff]  }
 0x158   :  { %1171 = vmatpush1.bf16.msra.mxu0 %v2137_v4  ;;  %1212 = vmatpush1.bf16.msra.mxu1 %v2140_v5  ;;  %v2208_v4 = vld [vmem:[#allocation11 + $0x144] ss:$8 sps:$4 sm:$0xff]   ;;  %v2203_v5 = vld [vmem:[#allocation11 + $0x40] ss:$8 sps:$4 sm:$0xff]  }
 0x159   :  { %1172 = vmatprep.subr.bf16.mxu0 %v2145_v7  ;;  %1213 = vmatprep.subr.bf16.mxu1 %v2148_v8  ;;  %v2211_v7 = vld [vmem:[#allocation11 + $0x34] ss:$8 sps:$4 sm:$0xff]  }
 0x15a   :  { %1202 = vmatprep.mubr.bf16.mxu0 %v2443_v35  ;;  %1243 = vmatprep.mubr.bf16.mxu1 %v2443_v35  ;;  %v2214_v8 = vld [vmem:[#allocation11 + $0x134] ss:$8 sps:$4 sm:$0xff]   ;;  %v2253_v35 = vld [vmem:[#allocation11 + $0xc4] ss:$8 sps:$4 sm:$0xff]  }
 0x15c   :  { %1173 = vmatpush1.bf16.msra.mxu0 %v2143_v9  ;;  %1214 = vmatpush1.bf16.msra.mxu1 %v2146_v10  ;;  %v2209_v9 = vld [vmem:[#allocation11 + $0x30] ss:$8 sps:$4 sm:$0xff]  }
 0x15d   :  { %1174 = vmatprep.subr.bf16.mxu0 %v2151_v11  ;;  %1215 = vmatprep.subr.bf16.mxu1 %v2154_v12  ;;  %v2212_v10 = vld [vmem:[#allocation11 + $0x130] ss:$8 sps:$4 sm:$0xff]   ;;  %v2217_v11 = vld [vmem:[#allocation11 + $0x24] ss:$8 sps:$4 sm:$0xff]  }
 0x15e   :  { %v2220_v12 = vld [vmem:[#allocation11 + $0x124] ss:$8 sps:$4 sm:$0xff]  }
 0x160   :  { %1175 = vmatpush1.bf16.msra.mxu0 %v2149_v13  ;;  %1216 = vmatpush1.bf16.msra.mxu1 %v2152_v14  ;;  %v2215_v13 = vld [vmem:[#allocation11 + $0x20] ss:$8 sps:$4 sm:$0xff]  }
 0x161   :  { %1176 = vmatprep.subr.bf16.mxu0 %v2157_v15  ;;  %1217 = vmatprep.subr.bf16.mxu1 %v2160_v16  ;;  %v2218_v14 = vld [vmem:[#allocation11 + $0x120] ss:$8 sps:$4 sm:$0xff]   ;;  %v2223_v15 = vld [vmem:[#allocation11 + $0x14] ss:$8 sps:$4 sm:$0xff]  }
 0x162   :  { %v2226_v16 = vld [vmem:[#allocation11 + $0x114] ss:$8 sps:$4 sm:$0xff]  }
 0x164   :  { %1177 = vmatpush1.bf16.msra.mxu0 %v2155_v17  ;;  %1218 = vmatpush1.bf16.msra.mxu1 %v2158_v18  ;;  %v2221_v17 = vld [vmem:[#allocation11 + $0x10] ss:$8 sps:$4 sm:$0xff]  }
 0x165   :  { %1178 = vmatprep.subr.bf16.mxu0 %v2163_v19  ;;  %1219 = vmatprep.subr.bf16.mxu1 %v2166_v20  ;;  %v2224_v18 = vld [vmem:[#allocation11 + $0x110] ss:$8 sps:$4 sm:$0xff]   ;;  %v2229_v19 = vld [vmem:[#allocation11 + $0x4] ss:$8 sps:$4 sm:$0xff]  }
 0x166   :  { %v2232_v20 = vld [vmem:[#allocation11 + $0x104] ss:$8 sps:$4 sm:$0xff]  }
 0x168   :  { %1179 = vmatpush1.bf16.msra.mxu0 %v2161_v21  ;;  %1220 = vmatpush1.bf16.msra.mxu1 %v2164_v22  ;;  %v2227_v21 = vld [vmem:[#allocation11] ss:$8 sps:$4 sm:$0xff]  }
 0x169   :  { %1180 = vmatprep.subr.bf16.mxu0 %v2169_v23  ;;  %1221 = vmatprep.subr.bf16.mxu1 %v2172_v24  ;;  %v2230_v22 = vld [vmem:[#allocation11 + $0x100] ss:$8 sps:$4 sm:$0xff]   ;;  %v2235_v23 = vld [vmem:[#allocation11 + $0xf4] ss:$8 sps:$4 sm:$0xff]  }
 0x16a   :  { %v2238_v24 = vld [vmem:[#allocation11 + $0x1f4] ss:$8 sps:$4 sm:$0xff]  }
 0x16c   :  { %1181 = vmatpush1.bf16.msra.mxu0 %v2167_v25  ;;  %1222 = vmatpush1.bf16.msra.mxu1 %v2170_v26  ;;  %v2233_v25 = vld [vmem:[#allocation11 + $0xf0] ss:$8 sps:$4 sm:$0xff]  }
 0x16d   :  { %1182 = vmatprep.subr.bf16.mxu0 %v2175_v27  ;;  %1223 = vmatprep.subr.bf16.mxu1 %v2178_v28  ;;  %v2236_v26 = vld [vmem:[#allocation11 + $0x1f0] ss:$8 sps:$4 sm:$0xff]   ;;  %v2241_v27 = vld [vmem:[#allocation11 + $0xe4] ss:$8 sps:$4 sm:$0xff]  }
 0x16e   :  { %v2244_v28 = vld [vmem:[#allocation11 + $0x1e4] ss:$8 sps:$4 sm:$0xff]  }
 0x170   :  { %1183 = vmatpush1.bf16.msra.mxu0 %v2173_v29  ;;  %1224 = vmatpush1.bf16.msra.mxu1 %v2176_v30  ;;  %v2239_v29 = vld [vmem:[#allocation11 + $0xe0] ss:$8 sps:$4 sm:$0xff]  }
 0x171   :  { %1184 = vmatprep.subr.bf16.mxu0 %v2181_v31  ;;  %1225 = vmatprep.subr.bf16.mxu1 %v2184_v32  ;;  %v2242_v30 = vld [vmem:[#allocation11 + $0x1e0] ss:$8 sps:$4 sm:$0xff]   ;;  %v2247_v31 = vld [vmem:[#allocation11 + $0xd4] ss:$8 sps:$4 sm:$0xff]  }
 0x172   :  { %v2250_v32 = vld [vmem:[#allocation11 + $0x1d4] ss:$8 sps:$4 sm:$0xff]  }
 0x174   :  { %1185 = vmatpush1.bf16.msra.mxu0 %v2179_v33  ;;  %1226 = vmatpush1.bf16.msra.mxu1 %v2182_v34  ;;  %v2245_v33 = vld [vmem:[#allocation11 + $0xd0] ss:$8 sps:$4 sm:$0xff]  }
 0x175   :  { %1656 = vmatprep.subr.bf16.mxu0 %v2187_v36  ;;  %1697 = vmatprep.subr.bf16.mxu1 %v2190_v37  ;;  %v2248_v34 = vld [vmem:[#allocation11 + $0x1d0] ss:$8 sps:$4 sm:$0xff]   ;;  %v2256_v36 = vld [vmem:[#allocation11 + $0x1c4] ss:$8 sps:$4 sm:$0xff]   ;;  %v2251_v37 = vld [vmem:[#allocation11 + $0xc0] ss:$8 sps:$4 sm:$0xff]  }
 0x217   :  { %v1967_v38 = vpop.f32.mrf.mxu0  ;;  %v1989_v42 = vpop.f32.mrf.mxu1 }
 0x219   :  { %v1968_v46 = vpop.f32.mrf.mxu0  ;;  %v1990_v47 = vpop.f32.mrf.mxu1 }
 0x21a   :  { %v1969_v48 = vadd.f32 %v1968_v46, %v1967_v38  ;;  %v1991_v52 = vadd.f32 %v1990_v47, %v1989_v42  ;;  %v2254_v38 = vld [vmem:[#allocation11 + $0x1c0] ss:$8 sps:$4 sm:$0xff]   ;;  %v2259_v42 = vld [vmem:[#allocation11 + $0xb4] ss:$8 sps:$4 sm:$0xff]   ;;  %v2257_v46 = vld [vmem:[#allocation11 + $0xb0] ss:$8 sps:$4 sm:$0xff]  }
 0x21b   :  { %v1970_v49 = vpop.f32.mrf.mxu0  ;;  %v1992_v50 = vpop.f32.mrf.mxu1  ;;  %v2260_v47 = vld [vmem:[#allocation11 + $0x1b0] ss:$8 sps:$4 sm:$0xff]  }
 0x21c   :  { %v910_v51 = vadd.f32 %v1969_v48, %v1822_v45  ;;  %v2262_v45 = vld [vmem:[#allocation11 + $0x1b4] ss:$8 sps:$4 sm:$0xff]   ;;  %v2265_v48 = vld [vmem:[#allocation11 + $0xa4] ss:$8 sps:$4 sm:$0xff]   ;;  %v2263_v50 = vld [vmem:[#allocation11 + $0xa0] ss:$8 sps:$4 sm:$0xff]  }
 0x21d   :  { %v1971_v53 = vpop.f32.mrf.mxu0  ;;  %v1993_v54 = vpop.f32.mrf.mxu1  ;;  %v2268_v49 = vld [vmem:[#allocation11 + $0x1a4] ss:$8 sps:$4 sm:$0xff]  }
 0x21e   :  { %v950_v55 = vadd.f32 %v1991_v52, %v910_v51  ;;  %v2266_v51 = vld [vmem:[#allocation11 + $0x1a0] ss:$8 sps:$4 sm:$0xff]   ;;  %v2271_v52 = vld [vmem:[#allocation11 + $0x94] ss:$8 sps:$4 sm:$0xff]   ;;  %v2269_v54 = vld [vmem:[#allocation11 + $0x90] ss:$8 sps:$4 sm:$0xff]  }
 0x21f   :  { %v2274_v53 = vld [vmem:[#allocation11 + $0x194] ss:$8 sps:$4 sm:$0xff]  }
 0x220   :  { %v955_v58 = vpack.c.bf16 %v950_v55, %v950_v55  ;;  %v2272_v55 = vld [vmem:[#allocation11 + $0x190] ss:$8 sps:$4 sm:$0xff]  }
 0x222   :  { %1203 = vmatmul.mubr.bf16.vlgmr.msra.gmra.mxu0 %v955_v58  ;;  %1244 = vmatmul.mubr.bf16.vlgmr.msra.gmra.mxu1 %v955_v58  ;;  %v2275_v58 = vld [vmem:[#allocation11 + $0x80] ss:$8 sps:$4 sm:$0xff]  }
 0x223   :  { %1657 = vmatpush1.bf16.msra.mxu0 %v2185_v56  ;;  %1698 = vmatpush1.bf16.msra.mxu1 %v2188_v57  ;;  %v2277_v56 = vld [vmem:[#allocation11 + $0x84] ss:$8 sps:$4 sm:$0xff]  }
 0x224   :  { %1658 = vmatprep.subr.bf16.mxu0 %v2193_v59  ;;  %1699 = vmatprep.subr.bf16.mxu1 %v2196_v60  ;;  %v2280_v57 = vld [vmem:[#allocation11 + $0x184] ss:$8 sps:$4 sm:$0xff]   ;;  %v2278_v59 = vld [vmem:[#allocation11 + $0x180] ss:$8 sps:$4 sm:$0xff]  }
 0x225   :  { %v988_v60 = vld [vmem:[%s2561_s6] sm:$0xf] }
 0x227   :  { %1659 = vmatpush1.bf16.msra.mxu0 %v2191_v61  ;;  %1700 = vmatpush1.bf16.msra.mxu1 %v2194_v62  ;;  %v993_v61 = vrot.slane %v988_v60, %v2522_v40  ;;  %v1001_v62 = vrot.slane %v988_v60, %v192_v41 }
 0x228   :  { %1660 = vmatprep.subr.bf16.mxu0 %v2199_v63  ;;  %1701 = vmatprep.subr.bf16.mxu1 %v2202_v0  ;;  %v997_v63 = vrot.slane %v988_v60, %v2526_v43  ;;  %v1005_v0 = vrot.slane %v988_v60, %v196_v44 }
 0x22b   :  { %1661 = vmatpush1.bf16.msra.mxu0 %v2197_v1  ;;  %1702 = vmatpush1.bf16.msra.mxu1 %v2200_v2 }
 0x22c   :  { %1662 = vmatprep.subr.bf16.mxu0 %v2205_v3  ;;  %1703 = vmatprep.subr.bf16.mxu1 %v2208_v4 }
 0x22f   :  { %1663 = vmatpush1.bf16.msra.mxu0 %v2203_v5  ;;  %1704 = vmatpush1.bf16.msra.mxu1 %v2206_v6 }
 0x230   :  { %1664 = vmatprep.subr.bf16.mxu0 %v2211_v7  ;;  %1705 = vmatprep.subr.bf16.mxu1 %v2214_v8 }
 0x233   :  { %1665 = vmatpush1.bf16.msra.mxu0 %v2209_v9  ;;  %1706 = vmatpush1.bf16.msra.mxu1 %v2212_v10 }
 0x234   :  { %1666 = vmatprep.subr.bf16.mxu0 %v2217_v11  ;;  %1707 = vmatprep.subr.bf16.mxu1 %v2220_v12 }
 0x237   :  { %1667 = vmatpush1.bf16.msra.mxu0 %v2215_v13  ;;  %1708 = vmatpush1.bf16.msra.mxu1 %v2218_v14 }
 0x238   :  { %1668 = vmatprep.subr.bf16.mxu0 %v2223_v15  ;;  %1709 = vmatprep.subr.bf16.mxu1 %v2226_v16 }
 0x23b   :  { %1669 = vmatpush1.bf16.msra.mxu0 %v2221_v17  ;;  %1710 = vmatpush1.bf16.msra.mxu1 %v2224_v18  ;;  %v1324_v18 = vld [vmem:[%s2563_s8] sm:$0x3]  ;;  %s2401_s8 = scalar_lea.vmem %s1747_s23, 256 }
 0x23c   :  { %1670 = vmatprep.subr.bf16.mxu0 %v2229_v19  ;;  %1711 = vmatprep.subr.bf16.mxu1 %v2232_v20  ;;  %v1329_v19 = vrot.slane %v1324_v18, %v2522_v40  ;;  %v1333_v20 = vrot.slane %v1324_v18, %v2526_v43  ;;  %p2402_p2 = scmp.ne.s32.totalorder %s1747_s23, %s2401_s8  ;;  %p2407_p4 = scmp.lt.s32.totalorder %s2401_s8, %s2401_s8 }
 0x23e   :  { %p2408_p5 = por %p2407_p4, %p2406_p3 }
 0x23f   :  { %1671 = vmatpush1.bf16.msra.mxu0 %v2227_v21  ;;  %1712 = vmatpush1.bf16.msra.mxu1 %v2230_v22 }
 0x240   :  { %1672 = vmatprep.subr.bf16.mxu0 %v2235_v23  ;;  %1713 = vmatprep.subr.bf16.mxu1 %v2238_v24  ;;  %p2409_p6 = pnand %p2408_p5, %p2402_p2 }
 0x243   :  { %1673 = vmatpush2.bf16.msra.mxu0 %v2233_v25  ;;  %1714 = vmatpush2.bf16.msra.mxu1 %v2236_v26 }
 0x244   :  { %1674 = vmatprep.subr.bf16.mxu0 %v2241_v27  ;;  %1715 = vmatprep.subr.bf16.mxu1 %v2244_v28 }
 0x247   :  { %1675 = vmatpush2.bf16.msra.mxu0 %v2239_v29  ;;  %1716 = vmatpush2.bf16.msra.mxu1 %v2242_v30 }
 0x248   :  { %1676 = vmatprep.subr.bf16.mxu0 %v2247_v31  ;;  %1717 = vmatprep.subr.bf16.mxu1 %v2250_v32 }
 0x24b   :  { %1677 = vmatpush2.bf16.msra.mxu0 %v2245_v33  ;;  %1718 = vmatpush2.bf16.msra.mxu1 %v2248_v34 }
 0x24c   :  { %1678 = vmatprep.subr.bf16.mxu0 %v2253_v35  ;;  %1719 = vmatprep.subr.bf16.mxu1 %v2256_v36 }
 0x24f   :  { %1679 = vmatpush2.bf16.msra.mxu0 %v2251_v37  ;;  %1720 = vmatpush2.bf16.msra.mxu1 %v2254_v38 }
 0x250   :  { %1680 = vmatprep.subr.bf16.mxu0 %v2259_v42  ;;  %1721 = vmatprep.subr.bf16.mxu1 %v2262_v45 }
 0x253   :  { %1681 = vmatpush2.bf16.msra.mxu0 %v2257_v46  ;;  %1722 = vmatpush2.bf16.msra.mxu1 %v2260_v47 }
 0x254   :  { %1682 = vmatprep.subr.bf16.mxu0 %v2265_v48  ;;  %1723 = vmatprep.subr.bf16.mxu1 %v2268_v49 }
 0x257   :  { %1683 = vmatpush2.bf16.msra.mxu0 %v2263_v50  ;;  %1724 = vmatpush2.bf16.msra.mxu1 %v2266_v51 }
 0x258   :  { %1684 = vmatprep.subr.bf16.mxu0 %v2271_v52  ;;  %1725 = vmatprep.subr.bf16.mxu1 %v2274_v53 }
 0x25b   :  { %1685 = vmatpush2.bf16.msra.mxu0 %v2269_v54  ;;  %1726 = vmatpush2.bf16.msra.mxu1 %v2272_v55 }
 0x25c   :  { %1686 = vmatprep.subr.bf16.mxu0 %v2277_v56  ;;  %1727 = vmatprep.subr.bf16.mxu1 %v2280_v57 }
 0x25f   :  { %1687 = vmatpush2.bf16.msra.mxu0 %v2275_v58  ;;  %1728 = vmatpush2.bf16.msra.mxu1 %v2278_v59 }
 0x2e2   :  { %v1204_v1 = vpop.f32.mrf.mxu0  ;;  %v1245_v2 = vpop.f32.mrf.mxu1 }
 0x2e3   :  { %v1205_v3 = vadd.f32 %v1204_v1, %v993_v61  ;;  %v1246_v4 = vadd.f32 %v1245_v2, %v1001_v62 }
 0x2e4   :  { %v1206_v5 = vpop.f32.mrf.mxu0  ;;  %v1247_v6 = vpop.f32.mrf.mxu1 }
 0x2e5   :  { %v1207_v7 = vadd.f32 %v1206_v5, %v997_v63  ;;  %v1248_v8 = vadd.f32 %v1247_v6, %v1005_v0  ;;  %v1252_v9 = vmax.f32 %v1205_v3, 0.0  ;;  %v1254_v10 = vmax.f32 %v1246_v4, 0.0 }
 0x2e6   :  { %v1208_v11 = vpop.f32.mrf.mxu0  ;;  %v1249_v12 = vpop.f32.mrf.mxu1 }
 0x2e7   :  { %v1253_v13 = vmax.f32 %v1207_v7, 0.0  ;;  %v1255_v14 = vmax.f32 %v1248_v8, 0.0  ;;  %v1256_v39 = vpack.c.bf16 %v1252_v9, %v1252_v9  ;;  %v1258_v44 = vpack.c.bf16 %v1254_v10, %v1254_v10 }
 0x2e8   :  { %v1209_v41 = vpop.f32.mrf.mxu0  ;;  %v1250_v15 = vpop.f32.mrf.mxu1 }
 0x2e9   :  { %v1257_v16 = vpack.c.bf16 %v1253_v13, %v1253_v13  ;;  %v1259_v17 = vpack.c.bf16 %v1255_v14, %v1255_v14 }
 0x2eb   :  { %1688 = vmatprep.mubr.bf16.mxu0 %v1257_v16  ;;  %1729 = vmatprep.mubr.bf16.mxu1 %v1259_v17 }
 0x2ec   :  { %1689 = vmatmul.mubr.bf16.vlgmr.msra.gmra.mxu0 %v1256_v39  ;;  %1730 = vmatmul.mubr.bf16.vlgmr.msra.gmra.mxu1 %v1258_v44 }
 0x3ac   :  { %v1690_v21 = vpop.f32.mrf.mxu0  ;;  %v1731_v22 = vpop.f32.mrf.mxu1 }
 0x3ad   :  { %v1691_v23 = vadd.f32 %v1690_v21, %v1329_v19 }
 0x3ae   :  { %v1692_v24 = vpop.f32.mrf.mxu0  ;;  %v1733_v25 = vpop.f32.mrf.mxu1 }
 0x3af   :  { %v1732_v26 = vadd.f32 %v1731_v22, %v1691_v23  ;;  %v1693_v27 = vadd.f32 %v1692_v24, %v1333_v20 }
 0x3b0   :  { %v1694_v28 = vpop.f32.mrf.mxu0  ;;  %v1735_v29 = vpop.f32.mrf.mxu1 }
 0x3b1   :  { %1738 = vst [vmem:[#allocation13] sm:$0xff] %v1732_v26  ;;  %v1734_v30 = vadd.f32 %v1733_v25, %v1693_v27 }
 0x3b2   :  { %v1695_v31 = vpop.f32.mrf.mxu0  ;;  %v1736_v32 = vpop.f32.mrf.mxu1 }
 0x3b3   :  { %1739 = vst [vmem:[#allocation13 + $0x8] sm:$0xff] %v1734_v30 }
 0x3b4   :  { %2412 = shalt.err (!%p2409_p6)
}
 0x3b5   :  { %1749 = dma.vmem_to_hbm [thread:$0]  %s1747_s23, 256, %s2564_s9, [#allocation4]  }
 0x3b6   :  { %2429 = dma.done.wait [#allocation4], 256  }
 0x3b7   :  { %2430 = vsyncadd [#allocation4], 4294967040 }
 0x3b8   :  { %1753 = vsyncpa [#allocation3], 1 }
 0x3b9   :  { %1754 = vsyncpa [#allocation6], 1 }
 0x3ba   :  { %1755 = vsyncpa [#allocation9], 1 }
 0x3bb   :  { %1756 = vsyncpa [#allocation12], 1 }
 0x3bc   :  { %1757 = vsyncpa [#allocation4], 1 }

</bundles_post_ra>
